<compile_context>
chip_gen: v7x
topology: tpu7x:2x2x1
jax: 0.10.0
libtpu: 0.0.40
codegen_flags: <defaults>
</compile_context>

<pallas_src>
import functools
import math

import jax
import jax.numpy as jnp
from jax import lax
from jax.experimental import pallas as pl
from jax.experimental.pallas import tpu as pltpu

_LANE = 128


@functools.lru_cache(maxsize=1)
def _vmem_limit_bytes():
    # Generation-aware scoped-VMEM limit (v5e/v6e: 128 MiB phys, v7x: 64 MiB).
    try:
        cap = int(pltpu.get_tpu_info().vmem_capacity_bytes)
    except Exception:
        cap = 64 * 1024 * 1024
    return int(min(cap * 3 // 4, 96 * 1024 * 1024))


# ---------------------------------------------------------------------------
# Pallas kernels
# ---------------------------------------------------------------------------
def _conv3x3_kernel(x_ref, w_ref, b_ref, o_ref, *, act, wp, tl):
    """One (batch, spatial-tile) step of a 3x3 conv as 9 accumulating matmuls.

    x_ref: (Cin, TL + 2*Wp + 2) bf16 -- width/height zero-padded input rows,
           flattened with row stride Wp = W + 2, including the halo.
    w_ref: (9, Cout, Cin) bf16 -- tap-major weights (k = 3*ky + kx).
    b_ref: (Cout, 1) f32.
    o_ref: (Cout, TL) -- lane-dense output tile (spatial last); columns
           {W, W+1} of each row are junk and sliced off by the wrapper.
    """
    x = x_ref[...]                                       # (Cin, TL + halo) bf16
    cout = o_ref.shape[0]
    acc = jnp.zeros((cout, tl), jnp.float32)
    for ky in range(3):
        for kx in range(3):
            off = ky * wp + kx
            acc = acc + jnp.dot(w_ref[3 * ky + kx],      # (Cout, Cin) bf16
                                x[:, off:off + tl],      # shifted VMEM view
                                preferred_element_type=jnp.float32)
    acc = acc + b_ref[...]
    if act == "relu":
        acc = jnp.maximum(acc, 0.0)
    o_ref[...] = acc.astype(o_ref.dtype)


def _merge_kernel(r_ref, w0_ref, w2_ref, o_ref):
    """res = sigmoid(r[:3])*2-1; mask = sigmoid(r[3]); merged = w0*m + w2*(1-m);
    pred = clamp(merged + res, 0, 1).  Layout: (channels, flat_spatial)."""
    r = r_ref[...]                                       # (4, TL)
    res = jax.nn.sigmoid(r[:3, :]) * 2.0 - 1.0
    mask = jax.nn.sigmoid(r[3:4, :])                     # broadcast over 3 ch
    merged = w0_ref[...] * mask + w2_ref[...] * (1.0 - mask)
    o_ref[...] = jnp.clip(merged + res, 0.0, 1.0)


# ---------------------------------------------------------------------------
# Pallas wrappers
# ---------------------------------------------------------------------------
def _conv_tile_lanes(lo, cin, cout):
    """Flat-spatial tile size (lanes): whole image if small, else a 128-multiple
    sized against a per-block VMEM byte budget (pipeline double-buffers it)."""
    per_lane_bytes = cin * 2 + cout * 4          # bf16 input + f32 accum/output
    budget = 4 * 1024 * 1024
    tl = max(_LANE * 4, (budget // per_lane_bytes) // _LANE * _LANE)
    if lo <= tl:
        return lo, 1                             # single tile: full-dim block
    return tl, -(-lo // tl)


def conv3x3(x, w_oihw, b, act="none", out_dtype=jnp.float32):
    """3x3 conv, stride 1, pad 1 (PyTorch Conv2d semantics), NCHW in / NCHW out.

    w_oihw: (Cout, Cin, 3, 3) float32, b: (Cout,) float32.
    """
    N, Cin, H, W = x.shape
    Cout = w_oihw.shape[0]
    Wp = W + 2                       # padded row length
    Lo = H * Wp                      # flat output length (2 junk cols per row)
    halo = 2 * Wp + 2
    TL, T = _conv_tile_lanes(Lo, Cin, Cout)

    # Zero-pad H/W by 1, flatten rows (stride Wp), append tail pad, then
    # materialize per-tile overlap (halo) -- ~1x HBM amplification vs 9x im2col.
    xp = jnp.pad(x.astype(jnp.bfloat16), ((0, 0), (0, 0), (1, 1), (1, 1)))
    xf = xp.reshape(N, Cin, (H + 2) * Wp)
    need = T * TL + halo
    xf = jnp.pad(xf, ((0, 0), (0, 0), (0, need - xf.shape[-1])))
    xt = jnp.stack([xf[:, :, t * TL: t * TL + TL + halo] for t in range(T)],
                   axis=1)                                   # (N, T, Cin, TL+halo)

    w9 = jnp.transpose(w_oihw, (2, 3, 0, 1)).reshape(9, Cout, Cin)
    w9 = w9.astype(jnp.bfloat16)
    b2 = b.reshape(Cout, 1).astype(jnp.float32)

    flops = 2 * 9 * Cin * Cout * N * T * TL
    bytes_accessed = (xt.size * 2 + w9.size * 2 + b2.size * 4
                      + N * Cout * T * TL * jnp.dtype(out_dtype).itemsize)

    out = pl.pallas_call(
        functools.partial(_conv3x3_kernel, act=act, wp=Wp, tl=TL),
        out_shape=jax.ShapeDtypeStruct((N, Cout, T * TL), out_dtype),
        grid=(N, T),
        in_specs=[
            pl.BlockSpec((None, None, Cin, TL + halo), lambda n, t: (n, t, 0, 0)),
            pl.BlockSpec((9, Cout, Cin), lambda n, t: (0, 0, 0)),
            pl.BlockSpec((Cout, 1), lambda n, t: (0, 0)),
        ],
        out_specs=pl.BlockSpec((None, Cout, TL), lambda n, t: (n, 0, t)),
        compiler_params=pltpu.CompilerParams(
            dimension_semantics=("parallel", "parallel"),
            vmem_limit_bytes=_vmem_limit_bytes()),
        cost_estimate=pl.CostEstimate(flops=flops, transcendentals=0,
                                      bytes_accessed=bytes_accessed),
    )(xt, w9, b2)

    out = out[:, :, :Lo].reshape(N, Cout, H, Wp)[:, :, :, :W]
    return out


def fuse_and_merge(refine_output, warped_hr0, warped_hr2):
    """Final elementwise hot path of HSTRNet.forward, lane-dense (spatial last)."""
    N, _, H, W = refine_output.shape
    HW = H * W
    if HW <= 32768:
        TL, T = HW, 1
    else:
        TL = 32768
        T = -(-HW // TL)

    r = refine_output.reshape(N, 4, HW).astype(jnp.float32)
    w0 = warped_hr0.reshape(N, 3, HW).astype(jnp.float32)
    w2 = warped_hr2.reshape(N, 3, HW).astype(jnp.float32)

    pred = pl.pallas_call(
        _merge_kernel,
        out_shape=jax.ShapeDtypeStruct((N, 3, HW), jnp.float32),
        grid=(N, T),
        in_specs=[
            pl.BlockSpec((None, 4, TL), lambda n, t: (n, 0, t)),
            pl.BlockSpec((None, 3, TL), lambda n, t: (n, 0, t)),
            pl.BlockSpec((None, 3, TL), lambda n, t: (n, 0, t)),
        ],
        out_specs=pl.BlockSpec((None, 3, TL), lambda n, t: (n, 0, t)),
        compiler_params=pltpu.CompilerParams(
            dimension_semantics=("parallel", "parallel"),
            vmem_limit_bytes=_vmem_limit_bytes()),
    )(r, w0, w2)
    return pred.reshape(N, 3, H, W)


# ---------------------------------------------------------------------------
# Plain-JAX glue (warp / resize) — RIFE conventions
# ---------------------------------------------------------------------------
def warp(img, flow):
    # TODO(synk): grid_sample's data-dependent per-pixel gather stays in plain
    # JAX (no clean Pallas TPU gather); bilinear, padding_mode='border',
    # align_corners=True, output spatial size follows the flow (RIFE warp).
    N, C, Hi, Wi = img.shape
    Hf, Wf = flow.shape[2], flow.shape[3]
    xs = jnp.linspace(-1.0, 1.0, Wf)
    ys = jnp.linspace(-1.0, 1.0, Hf)
    gy, gx = jnp.meshgrid(ys, xs, indexing="ij")
    nx = gx[None] + flow[:, 0] / ((Wi - 1.0) / 2.0)
    ny = gy[None] + flow[:, 1] / ((Hi - 1.0) / 2.0)
    px = jnp.clip((nx + 1.0) * 0.5 * (Wi - 1.0), 0.0, Wi - 1.0)
    py = jnp.clip((ny + 1.0) * 0.5 * (Hi - 1.0), 0.0, Hi - 1.0)
    x0 = jnp.floor(px)
    y0 = jnp.floor(py)
    wx = px - x0
    wy = py - y0
    x0i = jnp.clip(x0.astype(jnp.int32), 0, Wi - 1)
    y0i = jnp.clip(y0.astype(jnp.int32), 0, Hi - 1)
    x1i = jnp.clip(x0i + 1, 0, Wi - 1)
    y1i = jnp.clip(y0i + 1, 0, Hi - 1)

    def one(im, y0b, y1b, x0b, x1b, wxb, wyb):
        Ia = im[:, y0b, x0b]
        Ib = im[:, y0b, x1b]
        Ic = im[:, y1b, x0b]
        Id = im[:, y1b, x1b]
        return (Ia * (1 - wxb) * (1 - wyb) + Ib * wxb * (1 - wyb)
                + Ic * (1 - wxb) * wyb + Id * wxb * wyb)

    return jax.vmap(one)(img, y0i, y1i, x0i, x1i, wx, wy)


def upsample2x_bilinear(x):
    # Matches F.interpolate(scale_factor=2, mode='bilinear', align_corners=False)
    # (half-pixel centers). TODO(synk): edge handling may differ by float eps.
    N, C, H, W = x.shape
    return jax.image.resize(x, (N, C, 2 * H, 2 * W), method="bilinear")


def _avgpool2(x):
    N, C, H, W = x.shape
    return x.reshape(N, C, H // 2, 2, W // 2, 2).mean(axis=(3, 5))


# ---------------------------------------------------------------------------
# Synthetic sub-networks (deterministic weights; definitions not in source)
# ---------------------------------------------------------------------------
def _init_conv(key, cin, cout):
    kw, kb = jax.random.split(key)
    w = jax.random.normal(kw, (cout, cin, 3, 3), jnp.float32) / math.sqrt(9.0 * cin)
    b = jax.random.normal(kb, (cout,), jnp.float32) * 0.01
    return {"w": w, "b": b}


def init_params(key):
    ks = jax.random.split(key, 7)
    return {
        "ifnet": {"c0": _init_conv(ks[0], 6, 16),
                  "c1": _init_conv(ks[1], 16, 16),
                  "c2": _init_conv(ks[2], 16, 4)},
        "context": {"c0": _init_conv(ks[3], 3, 8)},
        "fusion": {"c0": _init_conv(ks[4], 47, 32),
                   "c1": _init_conv(ks[5], 32, 32),
                   "c2": _init_conv(ks[6], 32, 4)},
    }


def ifnet_flow(params, x):
    """Synthetic IFNet trunk: (B, 6, H, W) -> 4-channel flow."""
    # TODO(synk): fuse c0->c1->c2 into one halo-tiled kernel keeping the 16-ch
    # intermediates resident in VMEM scratch (removes 2 HBM round trips).
    f = conv3x3(x, params["c0"]["w"], params["c0"]["b"], act="relu",
                out_dtype=jnp.bfloat16)
    f = conv3x3(f, params["c1"]["w"], params["c1"]["b"], act="relu",
                out_dtype=jnp.bfloat16)
    return conv3x3(f, params["c2"]["w"], params["c2"]["b"], act="none",
                   out_dtype=jnp.float32)


def contextnet_features(params, imgs):
    """Synthetic ContextNet feature extractor: (B, 3, H, W) -> (B, 8, H, W)."""
    return conv3x3(imgs, params["c0"]["w"], params["c0"]["b"], act="relu",
                   out_dtype=jnp.bfloat16)


def fusionnet(params, w_lr0, lr1, w_lr2, w_hr0, w_hr2, c0_HR, c1_HR, c0_LR, c1_LR):
    # Synthetic FusionNet: the 2x-resolution warped-LR frames are average-pooled
    # back to base resolution before channel fusion (definition not in source).
    w_lr0 = _avgpool2(w_lr0)
    w_lr2 = _avgpool2(w_lr2)
    x = jnp.concatenate(
        [t.astype(jnp.bfloat16) for t in
         (w_lr0, lr1, w_lr2, w_hr0, w_hr2, c0_HR, c1_HR, c0_LR, c1_LR)], axis=1)
    f = conv3x3(x, params["c0"]["w"], params["c0"]["b"], act="relu",
                out_dtype=jnp.bfloat16)
    f = conv3x3(f, params["c1"]["w"], params["c1"]["b"], act="relu",
                out_dtype=jnp.bfloat16)
    return conv3x3(f, params["c2"]["w"], params["c2"]["b"], act="none",
                   out_dtype=jnp.float32)


# ---------------------------------------------------------------------------
# HSTRNet.forward
# ---------------------------------------------------------------------------
def hstrnet_forward(params, lr_images, hr_images):
    assert lr_images.shape[1] == 9
    assert hr_images.shape[1] == 6
    assert lr_images.shape[2] == hr_images.shape[2]
    assert lr_images.shape[3] == hr_images.shape[3]

    N = lr_images.shape[0]
    lr_img0 = lr_images[:, :3]
    lr_img1 = lr_images[:, 3:6]
    lr_img2 = lr_images[:, 6:9]

    # --- one batched IFNet trunk call (3 invocations share weights) ---
    ifnet_in = jnp.concatenate(
        [hr_images,
         jnp.concatenate((lr_img1, lr_img0), axis=1),
         jnp.concatenate((lr_img1, lr_img2), axis=1)], axis=0)       # (3N,6,H,W)
    flows = ifnet_flow(params["ifnet"], ifnet_in)
    flow = flows[:N]
    lr_F_1_0_ = flows[N:2 * N]
    lr_F_1_2_ = flows[2 * N:]

    warped_hr_img1_0 = warp(hr_images[:, :3], flow[:, :2])
    warped_hr_img1_2 = warp(hr_images[:, 3:6], flow[:, 2:4])

    lr_F_1_0 = upsample2x_bilinear(lr_F_1_0_ * -2.0) * 2.0
    lr_F_1_2 = upsample2x_bilinear(lr_F_1_2_ * 2.0) * 2.0

    warped_lr_img1_0 = warp(lr_img0, lr_F_1_0[:, :2])
    warped_lr_img1_2 = warp(lr_img2, lr_F_1_2[:, 2:4])

    # --- one batched ContextNet call (4 invocations share weights) ---
    ctx_imgs = jnp.concatenate(
        [hr_images[:, :3], hr_images[:, 3:6], lr_img0, lr_img2], axis=0)
    ctx_flows = jnp.concatenate(
        [flow[:, :2], flow[:, 2:4], lr_F_1_0_[:, :2], lr_F_1_2_[:, 2:4]], axis=0)
    ctx = warp(contextnet_features(params["context"], ctx_imgs), ctx_flows)
    c0_HR, c1_HR = ctx[:N], ctx[N:2 * N]
    c0_LR, c1_LR = ctx[2 * N:3 * N], ctx[3 * N:]

    refine_output = fusionnet(params["fusion"], warped_lr_img1_0, lr_img1,
                              warped_lr_img1_2, warped_hr_img1_0,
                              warped_hr_img1_2, c0_HR, c1_HR, c0_LR, c1_LR)

    # res / mask / merged / clamp — fused elementwise Pallas kernel.
    return fuse_and_merge(refine_output, warped_hr_img1_0, warped_hr_img1_2)


if __name__ == "__main__":
    key = jax.random.PRNGKey(0)
    kp, k1, k2, k3, k4, k5 = jax.random.split(key, 6)

    # Standalone conv3x3 correctness check against the XLA conv (same bf16
    # rounding of operands, f32 accumulation) -> differences are ~1e-5.
    xc = jax.random.normal(k3, (2, 5, 12, 12), jnp.float32)
    wc = jax.random.normal(k4, (7, 5, 3, 3), jnp.float32) * 0.2
    bc = jax.random.normal(k5, (7,), jnp.float32) * 0.1
    got = conv3x3(xc, wc, bc, act="none", out_dtype=jnp.float32)
    ref = lax.conv_general_dilated(
        xc.astype(jnp.bfloat16).astype(jnp.float32),
        wc.astype(jnp.bfloat16).astype(jnp.float32),
        window_strides=(1, 1), padding="SAME",
        dimension_numbers=("NCHW", "OIHW", "NCHW")) + bc.reshape(1, -1, 1, 1)
    assert float(jnp.max(jnp.abs(got - ref))) < 5e-2

    params = init_params(kp)
    N, H, W = 2, 16, 16
    lr_images = jax.random.uniform(k1, (N, 9, H, W), dtype=jnp.float32)
    hr_images = jax.random.uniform(k2, (N, 6, H, W), dtype=jnp.float32)

    fwd = jax.jit(hstrnet_forward)
    pred = fwd(params, lr_images, hr_images)
    jax.block_until_ready(pred)

    assert pred.shape == (N, 3, H, W)
    assert bool(jnp.all(jnp.isfinite(pred)))
    assert bool(jnp.all((pred >= 0.0) & (pred <= 1.0)))
    print("KERNEL_OK")
</pallas_src>

<mosaic_0001>
module attributes {stable_mosaic.version = 11 : i64} {
  func.func @_conv3x3_kernel(%arg0: i32, %arg1: i32, %arg2: memref<1x1x5x198xbf16, #tpu.memory_space<vmem>>, %arg3: memref<9x7x5xbf16, #tpu.memory_space<vmem>>, %arg4: memref<7x1xf32, #tpu.memory_space<vmem>>, %arg5: memref<1x7x168xf32, #tpu.memory_space<vmem>>) attributes {dimension_semantics = [#tpu.dimension_semantics<parallel>, #tpu.dimension_semantics<parallel>], iteration_bounds = array<i64: 2, 1>, scalar_prefetch = 0 : i64, scratch_operands = 0 : i64, tpu.core_type = #tpu.core_type<tc>, window_params = [{transform_indices = @transform_0, window_bounds = array<i64: 1, 1, 5, 198>}, {pipeline_mode = #tpu.pipeline_mode<synchronous>, transform_indices = @transform_1, window_bounds = array<i64: 9, 7, 5>}, {pipeline_mode = #tpu.pipeline_mode<synchronous>, transform_indices = @transform_2, window_bounds = array<i64: 7, 1>}, {transform_indices = @transform_3, window_bounds = array<i64: 1, 7, 168>}]} {
    %c0 = arith.constant 0 : index
    %c0_0 = arith.constant 0 : index
    %c0_1 = arith.constant 0 : index
    %c0_2 = arith.constant 0 : index
    %0 = vector.load %arg2[%c0, %c0_0, %c0_1, %c0_2] : memref<1x1x5x198xbf16, #tpu.memory_space<vmem>>, vector<1x1x5x198xbf16>
    %1 = vector.shape_cast %0 : vector<1x1x5x198xbf16> to vector<5x198xbf16>
    %cst = arith.constant 0.000000e+00 : f32
    %2 = vector.broadcast %cst : f32 to vector<7x168xf32>
    %c0_3 = arith.constant 0 : index
    %c0_4 = arith.constant 0 : index
    %c0_5 = arith.constant 0 : index
    %3 = vector.load %arg3[%c0_3, %c0_4, %c0_5] : memref<9x7x5xbf16, #tpu.memory_space<vmem>>, vector<1x7x5xbf16>
    %4 = vector.shape_cast %3 : vector<1x7x5xbf16> to vector<7x5xbf16>
    %5 = vector.extract_strided_slice %1 {offsets = [0, 0], sizes = [5, 168], strides = [1, 1]} : vector<5x198xbf16> to vector<5x168xbf16>
    %cst_6 = arith.constant dense<0.000000e+00> : vector<7x168xf32>
    %6 = tpu.matmul %4, %5, %cst_6 {dimension_numbers = #tpu.dot_dimension_numbers<[1], [0], [0], [1], [0, 0, 1, 1], [], []>} : vector<7x5xbf16>, vector<5x168xbf16>, vector<7x168xf32> -> vector<7x168xf32>
    %7 = arith.addf %2, %6 : vector<7x168xf32>
    %c1 = arith.constant 1 : index
    %c0_7 = arith.constant 0 : index
    %c0_8 = arith.constant 0 : index
    %8 = vector.load %arg3[%c1, %c0_7, %c0_8] : memref<9x7x5xbf16, #tpu.memory_space<vmem>>, vector<1x7x5xbf16>
    %9 = vector.shape_cast %8 : vector<1x7x5xbf16> to vector<7x5xbf16>
    %10 = vector.extract_strided_slice %1 {offsets = [0, 1], sizes = [5, 168], strides = [1, 1]} : vector<5x198xbf16> to vector<5x168xbf16>
    %cst_9 = arith.constant dense<0.000000e+00> : vector<7x168xf32>
    %11 = tpu.matmul %9, %10, %cst_9 {dimension_numbers = #tpu.dot_dimension_numbers<[1], [0], [0], [1], [0, 0, 1, 1], [], []>} : vector<7x5xbf16>, vector<5x168xbf16>, vector<7x168xf32> -> vector<7x168xf32>
    %12 = arith.addf %7, %11 : vector<7x168xf32>
    %c2 = arith.constant 2 : index
    %c0_10 = arith.constant 0 : index
    %c0_11 = arith.constant 0 : index
    %13 = vector.load %arg3[%c2, %c0_10, %c0_11] : memref<9x7x5xbf16, #tpu.memory_space<vmem>>, vector<1x7x5xbf16>
    %14 = vector.shape_cast %13 : vector<1x7x5xbf16> to vector<7x5xbf16>
    %15 = vector.extract_strided_slice %1 {offsets = [0, 2], sizes = [5, 168], strides = [1, 1]} : vector<5x198xbf16> to vector<5x168xbf16>
    %cst_12 = arith.constant dense<0.000000e+00> : vector<7x168xf32>
    %16 = tpu.matmul %14, %15, %cst_12 {dimension_numbers = #tpu.dot_dimension_numbers<[1], [0], [0], [1], [0, 0, 1, 1], [], []>} : vector<7x5xbf16>, vector<5x168xbf16>, vector<7x168xf32> -> vector<7x168xf32>
    %17 = arith.addf %12, %16 : vector<7x168xf32>
    %c3 = arith.constant 3 : index
    %c0_13 = arith.constant 0 : index
    %c0_14 = arith.constant 0 : index
    %18 = vector.load %arg3[%c3, %c0_13, %c0_14] : memref<9x7x5xbf16, #tpu.memory_space<vmem>>, vector<1x7x5xbf16>
    %19 = vector.shape_cast %18 : vector<1x7x5xbf16> to vector<7x5xbf16>
    %20 = vector.extract_strided_slice %1 {offsets = [0, 14], sizes = [5, 168], strides = [1, 1]} : vector<5x198xbf16> to vector<5x168xbf16>
    %cst_15 = arith.constant dense<0.000000e+00> : vector<7x168xf32>
    %21 = tpu.matmul %19, %20, %cst_15 {dimension_numbers = #tpu.dot_dimension_numbers<[1], [0], [0], [1], [0, 0, 1, 1], [], []>} : vector<7x5xbf16>, vector<5x168xbf16>, vector<7x168xf32> -> vector<7x168xf32>
    %22 = arith.addf %17, %21 : vector<7x168xf32>
    %c4 = arith.constant 4 : index
    %c0_16 = arith.constant 0 : index
    %c0_17 = arith.constant 0 : index
    %23 = vector.load %arg3[%c4, %c0_16, %c0_17] : memref<9x7x5xbf16, #tpu.memory_space<vmem>>, vector<1x7x5xbf16>
    %24 = vector.shape_cast %23 : vector<1x7x5xbf16> to vector<7x5xbf16>
    %25 = vector.extract_strided_slice %1 {offsets = [0, 15], sizes = [5, 168], strides = [1, 1]} : vector<5x198xbf16> to vector<5x168xbf16>
    %cst_18 = arith.constant dense<0.000000e+00> : vector<7x168xf32>
    %26 = tpu.matmul %24, %25, %cst_18 {dimension_numbers = #tpu.dot_dimension_numbers<[1], [0], [0], [1], [0, 0, 1, 1], [], []>} : vector<7x5xbf16>, vector<5x168xbf16>, vector<7x168xf32> -> vector<7x168xf32>
    %27 = arith.addf %22, %26 : vector<7x168xf32>
    %c5 = arith.constant 5 : index
    %c0_19 = arith.constant 0 : index
    %c0_20 = arith.constant 0 : index
    %28 = vector.load %arg3[%c5, %c0_19, %c0_20] : memref<9x7x5xbf16, #tpu.memory_space<vmem>>, vector<1x7x5xbf16>
    %29 = vector.shape_cast %28 : vector<1x7x5xbf16> to vector<7x5xbf16>
    %30 = vector.extract_strided_slice %1 {offsets = [0, 16], sizes = [5, 168], strides = [1, 1]} : vector<5x198xbf16> to vector<5x168xbf16>
    %cst_21 = arith.constant dense<0.000000e+00> : vector<7x168xf32>
    %31 = tpu.matmul %29, %30, %cst_21 {dimension_numbers = #tpu.dot_dimension_numbers<[1], [0], [0], [1], [0, 0, 1, 1], [], []>} : vector<7x5xbf16>, vector<5x168xbf16>, vector<7x168xf32> -> vector<7x168xf32>
    %32 = arith.addf %27, %31 : vector<7x168xf32>
    %c6 = arith.constant 6 : index
    %c0_22 = arith.constant 0 : index
    %c0_23 = arith.constant 0 : index
    %33 = vector.load %arg3[%c6, %c0_22, %c0_23] : memref<9x7x5xbf16, #tpu.memory_space<vmem>>, vector<1x7x5xbf16>
    %34 = vector.shape_cast %33 : vector<1x7x5xbf16> to vector<7x5xbf16>
    %35 = vector.extract_strided_slice %1 {offsets = [0, 28], sizes = [5, 168], strides = [1, 1]} : vector<5x198xbf16> to vector<5x168xbf16>
    %cst_24 = arith.constant dense<0.000000e+00> : vector<7x168xf32>
    %36 = tpu.matmul %34, %35, %cst_24 {dimension_numbers = #tpu.dot_dimension_numbers<[1], [0], [0], [1], [0, 0, 1, 1], [], []>} : vector<7x5xbf16>, vector<5x168xbf16>, vector<7x168xf32> -> vector<7x168xf32>
    %37 = arith.addf %32, %36 : vector<7x168xf32>
    %c7 = arith.constant 7 : index
    %c0_25 = arith.constant 0 : index
    %c0_26 = arith.constant 0 : index
    %38 = vector.load %arg3[%c7, %c0_25, %c0_26] : memref<9x7x5xbf16, #tpu.memory_space<vmem>>, vector<1x7x5xbf16>
    %39 = vector.shape_cast %38 : vector<1x7x5xbf16> to vector<7x5xbf16>
    %40 = vector.extract_strided_slice %1 {offsets = [0, 29], sizes = [5, 168], strides = [1, 1]} : vector<5x198xbf16> to vector<5x168xbf16>
    %cst_27 = arith.constant dense<0.000000e+00> : vector<7x168xf32>
    %41 = tpu.matmul %39, %40, %cst_27 {dimension_numbers = #tpu.dot_dimension_numbers<[1], [0], [0], [1], [0, 0, 1, 1], [], []>} : vector<7x5xbf16>, vector<5x168xbf16>, vector<7x168xf32> -> vector<7x168xf32>
    %42 = arith.addf %37, %41 : vector<7x168xf32>
    %c8 = arith.constant 8 : index
    %c0_28 = arith.constant 0 : index
    %c0_29 = arith.constant 0 : index
    %43 = vector.load %arg3[%c8, %c0_28, %c0_29] : memref<9x7x5xbf16, #tpu.memory_space<vmem>>, vector<1x7x5xbf16>
    %44 = vector.shape_cast %43 : vector<1x7x5xbf16> to vector<7x5xbf16>
    %45 = vector.extract_strided_slice %1 {offsets = [0, 30], sizes = [5, 168], strides = [1, 1]} : vector<5x198xbf16> to vector<5x168xbf16>
    %cst_30 = arith.constant dense<0.000000e+00> : vector<7x168xf32>
    %46 = tpu.matmul %44, %45, %cst_30 {dimension_numbers = #tpu.dot_dimension_numbers<[1], [0], [0], [1], [0, 0, 1, 1], [], []>} : vector<7x5xbf16>, vector<5x168xbf16>, vector<7x168xf32> -> vector<7x168xf32>
    %47 = arith.addf %42, %46 : vector<7x168xf32>
    %c0_31 = arith.constant 0 : index
    %c0_32 = arith.constant 0 : index
    %48 = vector.load %arg4[%c0_31, %c0_32] : memref<7x1xf32, #tpu.memory_space<vmem>>, vector<7x1xf32>
    %49 = vector.broadcast %48 : vector<7x1xf32> to vector<7x168xf32>
    %50 = arith.addf %47, %49 : vector<7x168xf32>
    %c0_33 = arith.constant 0 : index
    %c0_34 = arith.constant 0 : index
    %c0_35 = arith.constant 0 : index
    %51 = vector.load %arg5[%c0_33, %c0_34, %c0_35] : memref<1x7x168xf32, #tpu.memory_space<vmem>>, vector<1x7x168xf32>
    %52 = vector.shape_cast %51 : vector<1x7x168xf32> to vector<7x168xf32>
    %53 = vector.shape_cast %50 : vector<7x168xf32> to vector<1x7x168xf32>
    tpu.vector_store %arg5[%c0_33, %c0_34, %c0_35], %53 {strides = array<i32>} : memref<1x7x168xf32, #tpu.memory_space<vmem>>, vector<1x7x168xf32>,
    return
  }
  func.func @transform_0(%arg0: i32, %arg1: i32) -> (i32, i32, i32, i32) {
    %c0_i32 = arith.constant 0 : i32
    %c0_i32_0 = arith.constant 0 : i32
    %c0_i32_1 = arith.constant 0 : i32
    return %arg0, %arg1, %c0_i32, %c0_i32_0 : i32, i32, i32, i32
  }
  func.func @transform_1(%arg0: i32, %arg1: i32) -> (i32, i32, i32) {
    %c0_i32 = arith.constant 0 : i32
    %c0_i32_0 = arith.constant 0 : i32
    %c0_i32_1 = arith.constant 0 : i32
    %c0_i32_2 = arith.constant 0 : i32
    return %c0_i32, %c0_i32_0, %c0_i32_1 : i32, i32, i32
  }
  func.func @transform_2(%arg0: i32, %arg1: i32) -> (i32, i32) {
    %c0_i32 = arith.constant 0 : i32
    %c0_i32_0 = arith.constant 0 : i32
    %c0_i32_1 = arith.constant 0 : i32
    return %c0_i32, %c0_i32_0 : i32, i32
  }
  func.func @transform_3(%arg0: i32, %arg1: i32) -> (i32, i32, i32) {
    %c0_i32 = arith.constant 0 : i32
    %c0_i32_0 = arith.constant 0 : i32
    return %arg0, %c0_i32, %arg1 : i32, i32, i32
  }
}

</mosaic_0001>

<bundles_post_ra>
// kernel: tpu_custom_call.1
= control target key start
LH: loop header
LB: loop body
LE: loop exit
PB: predicated region body
PF: predicated region fallthrough
CT: control target
= control target key end

     0   :  { %s973_s12 = smov 0   ;;  %s975_s13 = smov 0   ;;  %s1079_s0 = inlined_call_operand.vmem [shape: bf16[2,1,5,198], index: 0, kind: input, shape index: {}]   ;;  %s1080_s1 = inlined_call_operand.vmem [shape: bf16[9,7,5], index: 1, kind: input, shape index: {}]   ;;  %s1081_s2 = inlined_call_operand.vmem [shape: f32[7,1], index: 2, kind: input, shape index: {}]   ;;  %s1082_s3 = inlined_call_operand.vmem [shape: f32[2,7,168], index: 3, kind: output, shape index: {}]  }
   0x1   :  { %s977_s14 = smov 0  }
   0x2 LB: > { %s25_s15 = sadd.s32 1, %s937_s13  ;;  %p854_p0 = scmp.ge.s32.totalorder %s941_s14, 1  ;;  %s941_s14 = sphi %s977_s14, %s13_s14   ;;  %s937_s13 = sphi %s975_s13, %s1084_s13   ;;  %s933_s12 = sphi %s973_s12, %s1083_s12  }
   0x3   : > { %p27_p1 = scmp.ge.s32.totalorder %s25_s15, 2  ;;  %p157_p2 = scmp.lt.s32.totalorder %s941_s14, 3 }
   0x5   : > { %s1086_s15 = smov (%p27_p1, %s25_s15), 0  ;;  %p158_p3 = pnand %p854_p0, %p157_p2 }
   0x6   : > { %p189_p4 = scmp.lt.s32.totalorder (!%p158_p3), %s933_s12, 1  ;;  %vm228_vm0 = vcmask (!%p158_p3), 1041408   ;;  %vm229_vm1 = vcmask (!%p158_p3), 1042432   ;;  %v943_v0 = vmov (!%p158_p3), 65535   ;;  %v944_v2 = vmov (!%p158_p3), 0   ;;  %s945_s20 = smov (!%p158_p3), 126  }
   0x7   : > { %161 = sbr.rel (%p158_p3) target bundleno = 395 (0x18b), region = 32  ;;  %v230_v1 = vsel (!%p158_p3), %vm228_vm0, 4294967295, %v943_v0  ;;  %270 = vmatprep.mubr.bf16.mxu0 (!%p158_p3), %v944_v2  ;;  %320 = vmatprep.mubr.bf16.mxu1 (!%p158_p3), %v944_v2  ;;  %s946_s21 = smov (!%p158_p3), 127   ;;  %vm224_vm2 = vcmask (!%p158_p3), 39936   ;;  %v210_v9 = vld [vmem:[%s1080_s1] sm:$0xf] (!%p158_p3) }
   0x8   : > { %916 = vset.pattern.permute.xlu0 (!%p158_p3), %v944_v2  ;;  %v1000_v4 = vsel (!%p158_p3), %vm229_vm1, %v230_v1, 0  ;;  %s947_s24 = smov (!%p158_p3), 114   ;;  %s948_s25 = smov (!%p158_p3), 113   ;;  %v749_v10 = vld [vmem:[%s1081_s2] sm:$0x7f] (!%p158_p3)  ;;  %vm335_vm3 = vcmask (!%p158_p3), 1031168  }
   0x9   : > { %s949_s26 = smov (!%p158_p3), 112   ;;  %s950_s27 = smov (!%p158_p3), 100   ;;  %vm222_vm4 = vcmask (!%p158_p3), 1039360   ;;  %vm395_vm5 = vcmask (!%p158_p3), 932864   ;;  %v859_v21 = vld [vmem:[%s1080_s1 + $0x4] sm:$0xf] (!%p158_p3) }
   0xa   : > { %s951_s28 = smov (!%p158_p3), 99   ;;  %s952_s29 = smov (!%p158_p3), 98   ;;  %vm455_vm6 = vcmask (!%p158_p3), 924672   ;;  %v866_v29 = vld [vmem:[%s1080_s1 + $0xc] sm:$0xf] (!%p158_p3)  ;;  %vm515_vm7 = vcmask (!%p158_p3), 916480  }
   0xb   : > { %v864_v33 = vld [vmem:[%s1080_s1 + $0x8] sm:$0xf] (!%p158_p3)  ;;  %vm575_vm8 = vcmask (!%p158_p3), 818176   ;;  %v870_v41 = vld [vmem:[%s1080_s1 + $0x14] sm:$0xf] (!%p158_p3)  ;;  %vm635_vm9 = vcmask (!%p158_p3), 809984  }
   0xc   : > { %v868_v45 = vld [vmem:[%s1080_s1 + $0x10] sm:$0xf] (!%p158_p3)  ;;  %vm695_vm10 = vcmask (!%p158_p3), 801792   ;;  %v874_v53 = vld [vmem:[%s1080_s1 + $0x1c] sm:$0xf] (!%p158_p3)  ;;  %vm758_vm11 = vcmask (!%p158_p3), 325632  }
   0xd   : > { %v872_v57 = vld [vmem:[%s1080_s1 + $0x18] sm:$0xf] (!%p158_p3)  ;;  %v876_v58 = vld [vmem:[%s1080_s1 + $0x20] sm:$0xf] (!%p158_p3) }
   0xe   : > { %s1088_s12 = smov (!%p189_p4, %s933_s12), 1 }
   0xf   : > { %s880_s16 = sshll.u32 %s1088_s12, 3 }
  0x10   : > { %s197_s19 = scalar_lea.vmem %s1079_s0, %s880_s16 }
  0x11   : > { %v209_v3 = vld [vmem:[%s197_s19] sm:$0x77] }
  0x12   : > { %v860_v5 = vcombine.low %v209_v3, %v209_v3  ;;  %v861_v6 = vcombine.high %v209_v3, %v209_v3 }
  0x14   : > { %331 = vrot.lane.b32.xlu1 %v860_v5, %s945_s20  ;;  %218 = vrot.lane.b32.xlu0 %v860_v5, %s946_s21  ;;  %v286_v7 = vand.u32 %v861_v6, %v1000_v4  ;;  %v283_v8 = vand.u32 %v860_v5, %v1000_v4 }
  0x16   : > { %288 = vmatprep.subr.bf16.mxu1 %v286_v7 }
  0x17   : > { %289 = vmatpush1.bf16.msra.mxu1 %v283_v8 }
  0x18   : > { %333 = vrot.lane.b32.xlu1 %v861_v6, %s945_s20  ;;  %220 = vrot.lane.b32.xlu0 %v861_v6, %s946_s21 }
  0x1a   : > { %863 = vmatmul.mubr.msk.bf16.vlgmr.msra.gmra.mrb[0].mxu1 %vm224_vm2, %v210_v9 }
  0x1b   : > { %438 = vmatprep.mubr.bf16.mxu1 %v944_v2 }
  0x1c   : > { %393 = vrot.lane.b32.xlu1 %v861_v6, %s947_s24  ;;  %391 = vrot.lane.b32.xlu0 %v860_v5, %s947_s24 }
  0x20   : > { %453 = vrot.lane.b32.xlu1 %v861_v6, %s948_s25  ;;  %451 = vrot.lane.b32.xlu0 %v860_v5, %s948_s25  ;;  %s881_s25 = sshll.u32 %s1088_s12, 4 }
  0x24   : > { %513 = vrot.lane.b32.xlu1 %v861_v6, %s949_s26  ;;  %511 = vrot.lane.b32.xlu0 %v860_v5, %s949_s26 }
  0x28   : > { %573 = vrot.lane.b32.xlu1 %v861_v6, %s950_s27  ;;  %571 = vrot.lane.b32.xlu0 %v860_v5, %s950_s27 }
  0x2c   : > { %633 = vrot.lane.b32.xlu1 %v861_v6, %s951_s28  ;;  %631 = vrot.lane.b32.xlu0 %v860_v5, %s951_s28  ;;  %s206_s28 = scalar_lea.vmem %s1082_s3, %s881_s25 }
  0x30   : > { %693 = vrot.lane.b32.xlu1 %v861_v6, %s952_s29  ;;  %691 = vrot.lane.b32.xlu0 %v860_v5, %s952_s29 }
  0x34   : > { %752 = vperm.xlu0 %916, %v749_v10  }
  0x86   : > { %v332_v11 = vpop.permute.xlu1 %331  ;;  %v219_v12 = vpop.permute.xlu0 %218 }
  0x8a   : > { %v334_v13 = vpop.permute.xlu1 %333  ;;  %v221_v14 = vpop.permute.xlu0 %220 }
  0x8b   : > { %v336_v15 = vsel %vm335_vm3, %v332_v11, %v334_v13  ;;  %v344_v16 = vand.u32 %v334_v13, %v1000_v4  ;;  %v223_v17 = vsel %vm222_vm4, %v219_v12, %v221_v14  ;;  %v236_v18 = vand.u32 %v1000_v4, %v221_v14 }
  0x8c   : > { %v233_v19 = vand.u32 %v1000_v4, %v223_v17  ;;  %v341_v20 = vand.u32 %v336_v15, %v1000_v4 }
  0x8d   : > { %238 = vmatprep.subr.bf16.mxu0 %v236_v18 }
  0x8e   : > { %239 = vmatpush1.bf16.msra.mxu0 %v233_v19  ;;  %v394_v22 = vpop.permute.xlu1 %393  ;;  %v392_v23 = vpop.permute.xlu0 %391 }
  0x8f   : > { %346 = vmatprep.subr.bf16.mxu0 %v344_v16  ;;  %v404_v24 = vand.u32 %v394_v22, %v1000_v4  ;;  %v396_v25 = vsel %vm395_vm5, %v392_v23, %v394_v22 }
  0x90   : > { %v401_v26 = vand.u32 %v396_v25, %v1000_v4 }
  0x91   : > { %862 = vmatmul.mubr.msk.bf16.vlgmr.msra.gmra.mrb[0].mxu0 %vm224_vm2, %v859_v21  ;;  %406 = vmatprep.subr.bf16.mxu1 %v404_v24 }
  0x92   : > { %347 = vmatpush1.bf16.msra.mxu0 %v341_v20  ;;  %v454_v27 = vpop.permute.xlu1 %453  ;;  %v452_v28 = vpop.permute.xlu0 %451  ;;  %407 = vmatpush1.bf16.msra.mxu1 %v401_v26 }
  0x93   : > { %v464_v30 = vand.u32 %v454_v27, %v1000_v4  ;;  %v456_v31 = vsel %vm455_vm6, %v452_v28, %v454_v27  ;;  %378 = vmatprep.mubr.bf16.mxu0 %v944_v2 }
  0x94   : > { %v461_v32 = vand.u32 %v456_v31, %v1000_v4 }
  0x95   : > { %466 = vmatprep.subr.bf16.mxu0 %v464_v30  ;;  %867 = vmatmul.mubr.msk.bf16.vlgmr.msra.gmra.mrb[4].mxu1 %vm224_vm2, %v866_v29 }
  0x96   : > { %v514_v34 = vpop.permute.xlu1 %513  ;;  %v512_v35 = vpop.permute.xlu0 %511  ;;  %558 = vmatprep.mubr.bf16.mxu1 %v944_v2 }
  0x97   : > { %v524_v36 = vand.u32 %v514_v34, %v1000_v4  ;;  %v516_v37 = vsel %vm515_vm7, %v512_v35, %v514_v34 }
  0x98   : > { %v521_v38 = vand.u32 %v516_v37, %v1000_v4 }
  0x99   : > { %865 = vmatmul.mubr.msk.bf16.vlgmr.msra.gmra.mrb[4].mxu0 %vm224_vm2, %v864_v33  ;;  %526 = vmatprep.subr.bf16.mxu1 %v524_v36 }
  0x9a   : > { %467 = vmatpush1.bf16.msra.mxu0 %v461_v32  ;;  %v574_v39 = vpop.permute.xlu1 %573  ;;  %v572_v40 = vpop.permute.xlu0 %571  ;;  %527 = vmatpush1.bf16.msra.mxu1 %v521_v38 }
  0x9b   : > { %v584_v42 = vand.u32 %v574_v39, %v1000_v4  ;;  %v576_v43 = vsel %vm575_vm8, %v572_v40, %v574_v39  ;;  %498 = vmatprep.mubr.bf16.mxu0 %v944_v2 }
  0x9c   : > { %v581_v44 = vand.u32 %v576_v43, %v1000_v4 }
  0x9d   : > { %586 = vmatprep.subr.bf16.mxu0 %v584_v42  ;;  %871 = vmatmul.mubr.msk.bf16.vlgmr.msra.gmra.mrb[8].mxu1 %vm224_vm2, %v870_v41 }
  0x9e   : > { %v634_v46 = vpop.permute.xlu1 %633  ;;  %v632_v47 = vpop.permute.xlu0 %631  ;;  %678 = vmatprep.mubr.bf16.mxu1 %v944_v2 }
  0x9f   : > { %v644_v48 = vand.u32 %v634_v46, %v1000_v4  ;;  %v636_v49 = vsel %vm635_vm9, %v632_v47, %v634_v46 }
  0xa0   : > { %v641_v50 = vand.u32 %v636_v49, %v1000_v4 }
  0xa1   : > { %869 = vmatmul.mubr.msk.bf16.vlgmr.msra.gmra.mrb[8].mxu0 %vm224_vm2, %v868_v45  ;;  %646 = vmatprep.subr.bf16.mxu1 %v644_v48 }
  0xa2   : > { %587 = vmatpush1.bf16.msra.mxu0 %v581_v44  ;;  %v694_v51 = vpop.permute.xlu1 %693  ;;  %v692_v52 = vpop.permute.xlu0 %691  ;;  %647 = vmatpush1.bf16.msra.mxu1 %v641_v50 }
  0xa3   : > { %v704_v54 = vand.u32 %v694_v51, %v1000_v4  ;;  %v696_v55 = vsel %vm695_vm10, %v692_v52, %v694_v51  ;;  %618 = vmatprep.mubr.bf16.mxu0 %v944_v2 }
  0xa4   : > { %v701_v56 = vand.u32 %v696_v55, %v1000_v4 }
  0xa5   : > { %706 = vmatprep.subr.bf16.mxu0 %v704_v54  ;;  %875 = vmatmul.mubr.msk.bf16.vlgmr.msra.gmra.mrb[12].mxu1 %vm224_vm2, %v874_v53 }
  0xa9   : > { %873 = vmatmul.mubr.msk.bf16.vlgmr.msra.gmra.mrb[12].mxu0 %vm224_vm2, %v872_v57 }
  0xaa   : > { %707 = vmatpush1.bf16.msra.mxu0 %v701_v56  ;;  %738 = vmatprep.mubr.bf16.mxu0 %v944_v2 }
  0xb1   : > { %877 = vmatmul.mubr.msk.bf16.vlgmr.msra.gmra.mrb[16].mxu0 %vm224_vm2, %v876_v58 }
  0xb3   : > { %v753_v42 = vpop.permute.xlu0 %752 }
  0xed   : > { %v322_v59 = vpop.f32.mrb[0].mxu1 }
  0xee   : > { %v324_v60 = vpop.f32.mrb[1].mxu1 }
  0xef   : > { %v326_v61 = vpop.f32.mrb[2].mxu1 }
  0xf0   : > { %v327_v62 = vpop.f32.mrb[3].mxu1 }
 0x164   : > { %v272_v63 = vpop.f32.mrb[0].mxu0 }
 0x165   : > { %v323_v0 = vadd.f32 %v322_v59, %v272_v63  ;;  %v274_v1 = vpop.f32.mrb[1].mxu0 }
 0x166   : > { %v325_v3 = vadd.f32 %v324_v60, %v274_v1  ;;  %v276_v4 = vpop.f32.mrb[2].mxu0 }
 0x167   : > { %v277_v5 = vpop.f32.mrb[3].mxu0 }
 0x168   : > { %v440_v6 = vpop.f32.mrb[4].mxu1 }
 0x169   : > { %v442_v7 = vpop.f32.mrb[5].mxu1 }
 0x16a   : > { %v444_v8 = vpop.f32.mrb[6].mxu1 }
 0x16b   : > { %v445_v2 = vpop.f32.mrb[7].mxu1 }
 0x16c   : > { %v380_v9 = vpop.f32.mrb[4].mxu0 }
 0x16d   : > { %v387_v10 = vadd.f32 %v380_v9, %v323_v0  ;;  %v382_v11 = vpop.f32.mrb[5].mxu0 }
 0x16e   : > { %v388_v12 = vadd.f32 %v382_v11, %v325_v3  ;;  %v384_v13 = vpop.f32.mrb[6].mxu0 }
 0x16f   : > { %v447_v14 = vadd.f32 %v440_v6, %v387_v10  ;;  %v385_v15 = vpop.f32.mrb[7].mxu0 }
 0x170   : > { %v448_v16 = vadd.f32 %v442_v7, %v388_v12  ;;  %v560_v17 = vpop.f32.mrb[8].mxu1 }
 0x171   : > { %v562_v18 = vpop.f32.mrb[9].mxu1 }
 0x172   : > { %v564_v19 = vpop.f32.mrb[10].mxu1 }
 0x173   : > { %v565_v20 = vpop.f32.mrb[11].mxu1 }
 0x174   : > { %v500_v21 = vpop.f32.mrb[8].mxu0 }
 0x175   : > { %v507_v22 = vadd.f32 %v500_v21, %v447_v14  ;;  %v502_v23 = vpop.f32.mrb[9].mxu0 }
 0x176   : > { %v508_v24 = vadd.f32 %v502_v23, %v448_v16  ;;  %v504_v25 = vpop.f32.mrb[10].mxu0 }
 0x177   : > { %v567_v26 = vadd.f32 %v560_v17, %v507_v22  ;;  %v505_v27 = vpop.f32.mrb[11].mxu0 }
 0x178   : > { %v568_v28 = vadd.f32 %v562_v18, %v508_v24  ;;  %v680_v29 = vpop.f32.mrb[12].mxu1 }
 0x179   : > { %v682_v30 = vpop.f32.mrb[13].mxu1 }
 0x17a   : > { %v684_v31 = vpop.f32.mrb[14].mxu1 }
 0x17b   : > { %v685_v32 = vpop.f32.mrb[15].mxu1 }
 0x17c   : > { %v620_v33 = vpop.f32.mrb[12].mxu0 }
 0x17d   : > { %v627_v34 = vadd.f32 %v620_v33, %v567_v26  ;;  %v622_v35 = vpop.f32.mrb[13].mxu0 }
 0x17e   : > { %v628_v36 = vadd.f32 %v622_v35, %v568_v28  ;;  %v624_v37 = vpop.f32.mrb[14].mxu0 }
 0x17f   : > { %v687_v38 = vadd.f32 %v680_v29, %v627_v34  ;;  %v625_v39 = vpop.f32.mrb[15].mxu0 }
 0x180   : > { %v688_v40 = vadd.f32 %v682_v30, %v628_v36 }
 0x184   : > { %v740_v41 = vpop.f32.mrb[16].mxu0 }
 0x185   : > { %v747_v43 = vadd.f32 %v740_v41, %v687_v38  ;;  %v742_v44 = vpop.f32.mrb[17].mxu0 }
 0x186   : > { %v748_v45 = vadd.f32 %v742_v44, %v688_v40  ;;  %v744_v46 = vpop.f32.mrb[18].mxu0 }
 0x187   : > { %v755_v47 = vadd.f32 %v753_v42, %v747_v43  ;;  %v745_v48 = vpop.f32.mrb[19].mxu0 }
 0x188   : > { %v756_v49 = vadd.f32 %v753_v42, %v748_v45 }
 0x189   : > { %757 = vst [vmem:[%s206_s28] sm:$0x7f] %v755_v47 }
 0x18a   : > { %759 = vst.msk [vmem:[%s206_s28 + $0x8] sm:$0x7f] %vm758_vm11, %v756_v49 }
 0x18b PF: > { %s13_s14 = sadd.s32 1, %s941_s14   ;;  %s1083_s12 = smov %s937_s13 }
 0x18c   : > { %p10_p5 = scmp.ge.s32.totalorder %s13_s14, 4   ;;  %s1084_s13 = smov %s1086_s15 }
 0x18e   :  { %12 = sbr.rel (!%p10_p5) target bundleno = 2 (0x2), region = 70 }

</bundles_post_ra>
